<compile_context>
chip_gen: v7x
topology: tpu7x:2x2x1
jax: 0.10.0
libtpu: 0.0.40
codegen_flags: <defaults>
</compile_context>

<pallas_src>
import jax
import jax.numpy as jnp
from jax.experimental import pallas as pl
from jax.experimental.pallas import tpu as pltpu

LN_EPS = 1e-5

# Conservative budget for the VMEM-resident blocks (safe on v7x's 64 MiB; v6e/v5e have
# 128 MiB and could go bigger).
_VMEM_BLOCK_BUDGET = 40 * 1024 * 1024
_VMEM_LIMIT_BYTES = 50 * 1024 * 1024  # > 32 MiB scoped default, < v7x physical 64 MiB


def _round_up(x, m):
    return (x + m - 1) // m * m


def bert_output_kernel(h_ref, w_ref, b_ref, res_ref, gamma_ref, beta_ref, o_ref):
    # dense: [tm, K] @ [K, H] on the MXU with f32 accumulation.
    x = jnp.dot(h_ref[...], w_ref[...], preferred_element_type=jnp.float32)
    # bias + residual (dropout is identity in eval/inference mode).
    x = x + b_ref[...].astype(jnp.float32) + res_ref[...].astype(jnp.float32)

    # BertLayerNorm over the hidden dim (biased variance, eps=1e-5), fused epilogue:
    # mean via sum * (1/H); gamma folded into the rsqrt scale; write directly to o_ref.
    h = x.shape[-1]
    inv_h = jnp.float32(1.0 / h)
    mu = jnp.sum(x, axis=-1, keepdims=True) * inv_h
    d = x - mu
    var = jnp.sum(d * d, axis=-1, keepdims=True) * inv_h
    scale = gamma_ref[...].astype(jnp.float32) * jax.lax.rsqrt(var + LN_EPS)
    o_ref[...] = (d * scale + beta_ref[...].astype(jnp.float32)).astype(o_ref.dtype)


def _vmem_block_bytes(tm, K, H, h_bytes, w_bytes, res_bytes, out_bytes):
    # Double-buffered streamed tiles + (conservatively) double-buffered weight.
    return (2 * tm * K * h_bytes
            + 2 * K * H * w_bytes
            + 2 * tm * H * res_bytes
            + 2 * tm * H * out_bytes
            + 6 * H * 4)


def _build_call(N_pad, K, H, tm, out_dtype, single_buffer_invariants):
    const_kwargs = {}
    if single_buffer_invariants:
        # Weight / bias / gamma / beta have a constant index_map -> single-buffer them.
        const_kwargs = dict(pipeline_mode=pl.Buffered(1))

    in_specs = [
        pl.BlockSpec((tm, K), lambda i: (i, 0)),                  # hidden_states tile
        pl.BlockSpec((K, H), lambda i: (0, 0), **const_kwargs),   # full dense weight
        pl.BlockSpec((1, H), lambda i: (0, 0), **const_kwargs),   # dense bias
        pl.BlockSpec((tm, H), lambda i: (i, 0)),                  # residual tile
        pl.BlockSpec((1, H), lambda i: (0, 0), **const_kwargs),   # LN gamma
        pl.BlockSpec((1, H), lambda i: (0, 0), **const_kwargs),   # LN beta
    ]
    return pl.pallas_call(
        bert_output_kernel,
        out_shape=jax.ShapeDtypeStruct((N_pad, H), out_dtype),
        grid_spec=pltpu.PrefetchScalarGridSpec(
            num_scalar_prefetch=0,
            grid=(N_pad // tm,),
            in_specs=in_specs,
            out_specs=pl.BlockSpec((tm, H), lambda i: (i, 0)),
        ),
        compiler_params=pltpu.CompilerParams(
            dimension_semantics=("parallel",),   # row axis shards across TCs on v7x
            vmem_limit_bytes=_VMEM_LIMIT_BYTES,
        ),
    )


def bert_output(hidden_states, input_tensor, w, b, gamma, beta, *,
                tm=512, compute_dtype=None):
    """
    hidden_states : [N, intermediate_size]   (N = batch * seq, flattened tokens)
    input_tensor  : [N, hidden_size]         (residual)
    w             : [intermediate_size, hidden_size]
    b, gamma, beta: [hidden_size]
    compute_dtype : optional dtype (e.g. jnp.bfloat16) for the matmul operands; the MXU
                    accumulation and LayerNorm math stay in f32.
    """
    N, K = hidden_states.shape
    H = input_tensor.shape[-1]
    out_dtype = input_tensor.dtype

    if compute_dtype is not None:
        hidden_states = hidden_states.astype(compute_dtype)
        w = w.astype(compute_dtype)

    h_bytes = hidden_states.dtype.itemsize
    w_bytes = w.dtype.itemsize
    res_bytes = input_tensor.dtype.itemsize
    out_bytes = jnp.dtype(out_dtype).itemsize

    # Row tile: as large as possible (MXU utilization, fewer grid steps), clamped to the
    # (8-rounded) problem size and halved until the resident blocks fit the VMEM budget.
    tm = max(8, _round_up(min(tm, N), 8))
    while tm > 8 and _vmem_block_bytes(tm, K, H, h_bytes, w_bytes,
                                       res_bytes, out_bytes) > _VMEM_BLOCK_BUDGET:
        tm = max(8, _round_up(tm // 2, 8))

    # Pad the token dimension to a multiple of tm (padded rows discarded afterwards).
    N_pad = _round_up(N, tm)
    if N_pad != N:
        pad = N_pad - N
        hidden_states = jnp.pad(hidden_states, ((0, pad), (0, 0)))
        input_tensor = jnp.pad(input_tensor, ((0, pad), (0, 0)))

    b2 = b.reshape(1, H)
    g2 = gamma.reshape(1, H)
    be2 = beta.reshape(1, H)
    args = (hidden_states, w, b2, input_tensor, g2, be2)

    def _run(single_buffer_invariants):
        return _build_call(N_pad, K, H, tm, out_dtype, single_buffer_invariants)(*args)

    try:
        out = _run(True)     # single-buffer the invariant weight/bias/gamma/beta
    except Exception:        # pipeline_mode / Buffered(1) unsupported -> default buffering
        out = _run(False)

    return out[:N] if N_pad != N else out


def reference(hidden_states, input_tensor, w, b, gamma, beta):
    x = hidden_states @ w + b
    x = x + input_tensor     # dropout is identity in eval mode
    u = jnp.mean(x, axis=-1, keepdims=True)
    s = jnp.mean((x - u) ** 2, axis=-1, keepdims=True)
    xn = (x - u) / jnp.sqrt(s + LN_EPS)
    return gamma * xn + beta


if __name__ == "__main__":
    # Small config consistent with BertOutput: batch=2, seq=8,
    # intermediate_size=64, hidden_size=32.
    B, S, INTER, HID = 2, 8, 64, 32
    key = jax.random.PRNGKey(0)
    k1, k2, k3, k4 = jax.random.split(key, 4)

    hidden_states = jax.random.normal(k1, (B, S, INTER), dtype=jnp.float32)
    input_tensor = jax.random.normal(k2, (B, S, HID), dtype=jnp.float32)

    # Deterministic synthetic parameters: dense weight/bias, LN gamma=1, beta=0.
    w = jax.random.normal(k3, (INTER, HID), dtype=jnp.float32) * 0.02
    b = jax.random.normal(k4, (HID,), dtype=jnp.float32) * 0.02
    gamma = jnp.ones((HID,), dtype=jnp.float32)
    beta = jnp.zeros((HID,), dtype=jnp.float32)

    # Flatten tokens for the kernel, reshape back after.
    hs2d = hidden_states.reshape(B * S, INTER)
    res2d = input_tensor.reshape(B * S, HID)

    ref = reference(hs2d, res2d, w, b, gamma, beta)

    # f32 path: strict check against the reference.
    out = bert_output(hs2d, res2d, w, b, gamma, beta)
    jax.block_until_ready(out)
    assert jnp.allclose(out, ref, atol=1e-5, rtol=1e-5), "f32 mismatch vs reference"

    # Mixed-precision path: bf16 matmul operands, f32 accumulation + f32 LayerNorm.
    out_bf16 = bert_output(hs2d, res2d, w, b, gamma, beta, compute_dtype=jnp.bfloat16)
    jax.block_until_ready(out_bf16)
    assert jnp.allclose(out_bf16, ref, atol=5e-2, rtol=5e-2), "bf16 mismatch vs reference"

    out3d = out.reshape(B, S, HID)
    jax.block_until_ready(out3d)

    print("KERNEL_OK")
</pallas_src>

<mosaic_0001>
module attributes {stable_mosaic.version = 11 : i64} {
  func.func @bert_output_kernel(%arg0: i32, %arg1: memref<16x64xf32, #tpu.memory_space<vmem>>, %arg2: memref<64x32xf32, #tpu.memory_space<vmem>>, %arg3: memref<1x32xf32, #tpu.memory_space<vmem>>, %arg4: memref<16x32xf32, #tpu.memory_space<vmem>>, %arg5: memref<1x32xf32, #tpu.memory_space<vmem>>, %arg6: memref<1x32xf32, #tpu.memory_space<vmem>>, %arg7: memref<16x32xf32, #tpu.memory_space<vmem>>) attributes {dimension_semantics = [#tpu.dimension_semantics<parallel>], iteration_bounds = array<i64: 1>, scalar_prefetch = 0 : i64, scratch_operands = 0 : i64, tpu.core_type = #tpu.core_type<tc>, window_params = [{transform_indices = @transform_0, window_bounds = array<i64: 16, 64>}, {pipeline_mode = #tpu.pipeline_mode<synchronous>, transform_indices = @transform_1, window_bounds = array<i64: 64, 32>}, {pipeline_mode = #tpu.pipeline_mode<synchronous>, transform_indices = @transform_2, window_bounds = array<i64: 1, 32>}, {transform_indices = @transform_3, window_bounds = array<i64: 16, 32>}, {pipeline_mode = #tpu.pipeline_mode<synchronous>, transform_indices = @transform_4, window_bounds = array<i64: 1, 32>}, {pipeline_mode = #tpu.pipeline_mode<synchronous>, transform_indices = @transform_5, window_bounds = array<i64: 1, 32>}, {transform_indices = @transform_6, window_bounds = array<i64: 16, 32>}]} {
    %c0 = arith.constant 0 : index
    %c0_0 = arith.constant 0 : index
    %0 = vector.load %arg1[%c0, %c0_0] : memref<16x64xf32, #tpu.memory_space<vmem>>, vector<16x64xf32>
    %c0_1 = arith.constant 0 : index
    %c0_2 = arith.constant 0 : index
    %1 = vector.load %arg2[%c0_1, %c0_2] : memref<64x32xf32, #tpu.memory_space<vmem>>, vector<64x32xf32>
    %cst = arith.constant dense<0.000000e+00> : vector<16x32xf32>
    %2 = tpu.matmul %0, %1, %cst {dimension_numbers = #tpu.dot_dimension_numbers<[1], [0], [0], [1], [0, 0, 1, 1], [], []>} : vector<16x64xf32>, vector<64x32xf32>, vector<16x32xf32> -> vector<16x32xf32>
    %c0_3 = arith.constant 0 : index
    %c0_4 = arith.constant 0 : index
    %3 = vector.load %arg3[%c0_3, %c0_4] : memref<1x32xf32, #tpu.memory_space<vmem>>, vector<1x32xf32>
    %4 = vector.broadcast %3 : vector<1x32xf32> to vector<16x32xf32>
    %5 = arith.addf %2, %4 : vector<16x32xf32>
    %c0_5 = arith.constant 0 : index
    %c0_6 = arith.constant 0 : index
    %6 = vector.load %arg4[%c0_5, %c0_6] : memref<16x32xf32, #tpu.memory_space<vmem>>, vector<16x32xf32>
    %7 = arith.addf %5, %6 : vector<16x32xf32>
    %cst_7 = arith.constant dense<0.000000e+00> : vector<16xf32>
    %8 = vector.multi_reduction <add>, %7, %cst_7 [1] : vector<16x32xf32> to vector<16xf32>
    %9 = vector.shape_cast %8 : vector<16xf32> to vector<16x1xf32>
    %cst_8 = arith.constant 3.125000e-02 : f32
    %10 = vector.broadcast %cst_8 : f32 to vector<16x1xf32>
    %11 = arith.mulf %9, %10 : vector<16x1xf32>
    %12 = vector.broadcast %11 : vector<16x1xf32> to vector<16x32xf32>
    %13 = arith.subf %7, %12 : vector<16x32xf32>
    %14 = arith.mulf %13, %13 : vector<16x32xf32>
    %cst_9 = arith.constant dense<0.000000e+00> : vector<16xf32>
    %15 = vector.multi_reduction <add>, %14, %cst_9 [1] : vector<16x32xf32> to vector<16xf32>
    %16 = vector.shape_cast %15 : vector<16xf32> to vector<16x1xf32>
    %cst_10 = arith.constant 3.125000e-02 : f32
    %17 = vector.broadcast %cst_10 : f32 to vector<16x1xf32>
    %18 = arith.mulf %16, %17 : vector<16x1xf32>
    %c0_11 = arith.constant 0 : index
    %c0_12 = arith.constant 0 : index
    %19 = vector.load %arg5[%c0_11, %c0_12] : memref<1x32xf32, #tpu.memory_space<vmem>>, vector<1x32xf32>
    %cst_13 = arith.constant 9.99999974E-6 : f32
    %20 = vector.broadcast %cst_13 : f32 to vector<16x1xf32>
    %21 = arith.addf %18, %20 : vector<16x1xf32>
    %22 = math.rsqrt %21 : vector<16x1xf32>
    %23 = vector.broadcast %19 : vector<1x32xf32> to vector<16x32xf32>
    %24 = vector.broadcast %22 : vector<16x1xf32> to vector<16x32xf32>
    %25 = arith.mulf %23, %24 : vector<16x32xf32>
    %26 = arith.mulf %13, %25 : vector<16x32xf32>
    %c0_14 = arith.constant 0 : index
    %c0_15 = arith.constant 0 : index
    %27 = vector.load %arg6[%c0_14, %c0_15] : memref<1x32xf32, #tpu.memory_space<vmem>>, vector<1x32xf32>
    %28 = vector.broadcast %27 : vector<1x32xf32> to vector<16x32xf32>
    %29 = arith.addf %26, %28 : vector<16x32xf32>
    %c0_16 = arith.constant 0 : index
    %c0_17 = arith.constant 0 : index
    %30 = vector.load %arg7[%c0_16, %c0_17] : memref<16x32xf32, #tpu.memory_space<vmem>>, vector<16x32xf32>
    tpu.vector_store %arg7[%c0_16, %c0_17], %29 {strides = array<i32>} : memref<16x32xf32, #tpu.memory_space<vmem>>, vector<16x32xf32>,
    return
  }
  func.func @transform_0(%arg0: i32) -> (i32, i32) {
    %c0_i32 = arith.constant 0 : i32
    %c0_i32_0 = arith.constant 0 : i32
    return %arg0, %c0_i32 : i32, i32
  }
  func.func @transform_1(%arg0: i32) -> (i32, i32) {
    %c0_i32 = arith.constant 0 : i32
    %c0_i32_0 = arith.constant 0 : i32
    %c0_i32_1 = arith.constant 0 : i32
    return %c0_i32, %c0_i32_0 : i32, i32
  }
  func.func @transform_2(%arg0: i32) -> (i32, i32) {
    %c0_i32 = arith.constant 0 : i32
    %c0_i32_0 = arith.constant 0 : i32
    %c0_i32_1 = arith.constant 0 : i32
    return %c0_i32, %c0_i32_0 : i32, i32
  }
  func.func @transform_3(%arg0: i32) -> (i32, i32) {
    %c0_i32 = arith.constant 0 : i32
    %c0_i32_0 = arith.constant 0 : i32
    return %arg0, %c0_i32 : i32, i32
  }
  func.func @transform_4(%arg0: i32) -> (i32, i32) {
    %c0_i32 = arith.constant 0 : i32
    %c0_i32_0 = arith.constant 0 : i32
    %c0_i32_1 = arith.constant 0 : i32
    return %c0_i32, %c0_i32_0 : i32, i32
  }
  func.func @transform_5(%arg0: i32) -> (i32, i32) {
    %c0_i32 = arith.constant 0 : i32
    %c0_i32_0 = arith.constant 0 : i32
    %c0_i32_1 = arith.constant 0 : i32
    return %c0_i32, %c0_i32_0 : i32, i32
  }
  func.func @transform_6(%arg0: i32) -> (i32, i32) {
    %c0_i32 = arith.constant 0 : i32
    %c0_i32_0 = arith.constant 0 : i32
    return %arg0, %c0_i32 : i32, i32
  }
}

module attributes {stable_mosaic.version = 11 : i64} {
  func.func @bert_output_kernel(%arg0: i32, %arg1: memref<16x64xf32, #tpu.memory_space<vmem>>, %arg2: memref<64x32xf32, #tpu.memory_space<vmem>>, %arg3: memref<1x32xf32, #tpu.memory_space<vmem>>, %arg4: memref<16x32xf32, #tpu.memory_space<vmem>>, %arg5: memref<1x32xf32, #tpu.memory_space<vmem>>, %arg6: memref<1x32xf32, #tpu.memory_space<vmem>>, %arg7: memref<16x32xf32, #tpu.memory_space<vmem>>) attributes {dimension_semantics = [#tpu.dimension_semantics<parallel>], iteration_bounds = array<i64: 1>, scalar_prefetch = 0 : i64, scratch_operands = 0 : i64, tpu.core_type = #tpu.core_type<tc>, window_params = [{transform_indices = @transform_0, window_bounds = array<i64: 16, 64>}, {pipeline_mode = #tpu.pipeline_mode<synchronous>, transform_indices = @transform_1, window_bounds = array<i64: 64, 32>}, {pipeline_mode = #tpu.pipeline_mode<synchronous>, transform_indices = @transform_2, window_bounds = array<i64: 1, 32>}, {transform_indices = @transform_3, window_bounds = array<i64: 16, 32>}, {pipeline_mode = #tpu.pipeline_mode<synchronous>, transform_indices = @transform_4, window_bounds = array<i64: 1, 32>}, {pipeline_mode = #tpu.pipeline_mode<synchronous>, transform_indices = @transform_5, window_bounds = array<i64: 1, 32>}, {transform_indices = @transform_6, window_bounds = array<i64: 16, 32>}]} {
    %c0 = arith.constant 0 : index
    %c0_0 = arith.constant 0 : index
    %0 = vector.load %arg1[%c0, %c0_0] : memref<16x64xf32, #tpu.memory_space<vmem>>, vector<16x64xf32>
    %c0_1 = arith.constant 0 : index
    %c0_2 = arith.constant 0 : index
    %1 = vector.load %arg2[%c0_1, %c0_2] : memref<64x32xf32, #tpu.memory_space<vmem>>, vector<64x32xf32>
    %cst = arith.constant dense<0.000000e+00> : vector<16x32xf32>
    %2 = tpu.matmul %0, %1, %cst {dimension_numbers = #tpu.dot_dimension_numbers<[1], [0], [0], [1], [0, 0, 1, 1], [], []>} : vector<16x64xf32>, vector<64x32xf32>, vector<16x32xf32> -> vector<16x32xf32>
    %c0_3 = arith.constant 0 : index
    %c0_4 = arith.constant 0 : index
    %3 = vector.load %arg3[%c0_3, %c0_4] : memref<1x32xf32, #tpu.memory_space<vmem>>, vector<1x32xf32>
    %4 = vector.broadcast %3 : vector<1x32xf32> to vector<16x32xf32>
    %5 = arith.addf %2, %4 : vector<16x32xf32>
    %c0_5 = arith.constant 0 : index
    %c0_6 = arith.constant 0 : index
    %6 = vector.load %arg4[%c0_5, %c0_6] : memref<16x32xf32, #tpu.memory_space<vmem>>, vector<16x32xf32>
    %7 = arith.addf %5, %6 : vector<16x32xf32>
    %cst_7 = arith.constant dense<0.000000e+00> : vector<16xf32>
    %8 = vector.multi_reduction <add>, %7, %cst_7 [1] : vector<16x32xf32> to vector<16xf32>
    %9 = vector.shape_cast %8 : vector<16xf32> to vector<16x1xf32>
    %cst_8 = arith.constant 3.125000e-02 : f32
    %10 = vector.broadcast %cst_8 : f32 to vector<16x1xf32>
    %11 = arith.mulf %9, %10 : vector<16x1xf32>
    %12 = vector.broadcast %11 : vector<16x1xf32> to vector<16x32xf32>
    %13 = arith.subf %7, %12 : vector<16x32xf32>
    %14 = arith.mulf %13, %13 : vector<16x32xf32>
    %cst_9 = arith.constant dense<0.000000e+00> : vector<16xf32>
    %15 = vector.multi_reduction <add>, %14, %cst_9 [1] : vector<16x32xf32> to vector<16xf32>
    %16 = vector.shape_cast %15 : vector<16xf32> to vector<16x1xf32>
    %cst_10 = arith.constant 3.125000e-02 : f32
    %17 = vector.broadcast %cst_10 : f32 to vector<16x1xf32>
    %18 = arith.mulf %16, %17 : vector<16x1xf32>
    %c0_11 = arith.constant 0 : index
    %c0_12 = arith.constant 0 : index
    %19 = vector.load %arg5[%c0_11, %c0_12] : memref<1x32xf32, #tpu.memory_space<vmem>>, vector<1x32xf32>
    %cst_13 = arith.constant 9.99999974E-6 : f32
    %20 = vector.broadcast %cst_13 : f32 to vector<16x1xf32>
    %21 = arith.addf %18, %20 : vector<16x1xf32>
    %22 = math.rsqrt %21 : vector<16x1xf32>
    %23 = vector.broadcast %19 : vector<1x32xf32> to vector<16x32xf32>
    %24 = vector.broadcast %22 : vector<16x1xf32> to vector<16x32xf32>
    %25 = arith.mulf %23, %24 : vector<16x32xf32>
    %26 = arith.mulf %13, %25 : vector<16x32xf32>
    %c0_14 = arith.constant 0 : index
    %c0_15 = arith.constant 0 : index
    %27 = vector.load %arg6[%c0_14, %c0_15] : memref<1x32xf32, #tpu.memory_space<vmem>>, vector<1x32xf32>
    %28 = vector.broadcast %27 : vector<1x32xf32> to vector<16x32xf32>
    %29 = arith.addf %26, %28 : vector<16x32xf32>
    %c0_16 = arith.constant 0 : index
    %c0_17 = arith.constant 0 : index
    %30 = vector.load %arg7[%c0_16, %c0_17] : memref<16x32xf32, #tpu.memory_space<vmem>>, vector<16x32xf32>
    tpu.vector_store %arg7[%c0_16, %c0_17], %29 {strides = array<i32>} : memref<16x32xf32, #tpu.memory_space<vmem>>, vector<16x32xf32>,
    return
  }
  func.func @transform_0(%arg0: i32) -> (i32, i32) {
    %c0_i32 = arith.constant 0 : i32
    %c0_i32_0 = arith.constant 0 : i32
    return %arg0, %c0_i32 : i32, i32
  }
  func.func @transform_1(%arg0: i32) -> (i32, i32) {
    %c0_i32 = arith.constant 0 : i32
    %c0_i32_0 = arith.constant 0 : i32
    %c0_i32_1 = arith.constant 0 : i32
    return %c0_i32, %c0_i32_0 : i32, i32
  }
  func.func @transform_2(%arg0: i32) -> (i32, i32) {
    %c0_i32 = arith.constant 0 : i32
    %c0_i32_0 = arith.constant 0 : i32
    %c0_i32_1 = arith.constant 0 : i32
    return %c0_i32, %c0_i32_0 : i32, i32
  }
  func.func @transform_3(%arg0: i32) -> (i32, i32) {
    %c0_i32 = arith.constant 0 : i32
    %c0_i32_0 = arith.constant 0 : i32
    return %arg0, %c0_i32 : i32, i32
  }
  func.func @transform_4(%arg0: i32) -> (i32, i32) {
    %c0_i32 = arith.constant 0 : i32
    %c0_i32_0 = arith.constant 0 : i32
    %c0_i32_1 = arith.constant 0 : i32
    return %c0_i32, %c0_i32_0 : i32, i32
  }
  func.func @transform_5(%arg0: i32) -> (i32, i32) {
    %c0_i32 = arith.constant 0 : i32
    %c0_i32_0 = arith.constant 0 : i32
    %c0_i32_1 = arith.constant 0 : i32
    return %c0_i32, %c0_i32_0 : i32, i32
  }
  func.func @transform_6(%arg0: i32) -> (i32, i32) {
    %c0_i32 = arith.constant 0 : i32
    %c0_i32_0 = arith.constant 0 : i32
    return %arg0, %c0_i32 : i32, i32
  }
}

</mosaic_0001>

<bundles_post_ra>
// kernel: tpu_custom_call.1
= control target key start
LH: loop header
LB: loop body
LE: loop exit
PB: predicated region body
PF: predicated region fallthrough
CT: control target
= control target key end

     0   :  { %vm41_vm0 = vcmask 523264   ;;  %s374_s0 = inlined_call_operand.vmem [shape: f32[16,64], index: 0, kind: input, shape index: {}]   ;;  %s375_s1 = inlined_call_operand.vmem [shape: f32[64,32], index: 1, kind: input, shape index: {}]   ;;  %s376_s2 = inlined_call_operand.vmem [shape: f32[1,32], index: 2, kind: input, shape index: {}]   ;;  %s377_s3 = inlined_call_operand.vmem [shape: f32[16,32], index: 3, kind: input, shape index: {}]   ;;  %s378_s4 = inlined_call_operand.vmem [shape: f32[1,32], index: 4, kind: input, shape index: {}]   ;;  %s379_s5 = inlined_call_operand.vmem [shape: f32[1,32], index: 5, kind: input, shape index: {}]   ;;  %s380_s6 = inlined_call_operand.hbm [shape: f32[16,32], index: 6, kind: output, shape index: {}]  }
   0x1   :  { %v26_v0 = vld [vmem:[%s375_s1] sm:$0xff]  ;;  %v27_v1 = vld [vmem:[%s375_s1 + $0x8] sm:$0xff]  ;;  %v28_v2 = vld [vmem:[%s375_s1 + $0x10] sm:$0xff] }
   0x2   :  { %v224_v3 = vpack.c.bf16 %v27_v1, %v26_v0  ;;  %v29_v4 = vld [vmem:[%s375_s1 + $0x18] sm:$0xff]  ;;  %v30_v6 = vld [vmem:[%s375_s1 + $0x20] sm:$0xff]  ;;  %v31_v7 = vld [vmem:[%s375_s1 + $0x28] sm:$0xff] }
   0x3   :  { %v228_v5 = vpack.c.bf16 %v29_v4, %v28_v2  ;;  %v24_v8 = vld [vmem:[%s374_s0] sm:$0xff] }
   0x4   :  { %225 = vmatprep.subr.bf16.mxu0 %v224_v3  ;;  %221 = vmatprep.mubr.msk.f32.mxu0 %vm41_vm0, %v24_v8 }
   0x5   :  { %11 = vsyncpa [#allocation3], 0  ;;  %227 = vmatpush3.bf16.msra.mxu0 %v224_v3  ;;  %v232_v9 = vpack.c.bf16 %v31_v7, %v30_v6  ;;  %v32_v10 = vld [vmem:[%s375_s1 + $0x30] sm:$0xff]  ;;  %v33_v11 = vld [vmem:[%s375_s1 + $0x38] sm:$0xff]  ;;  %vm127_vm1 = vcmask 261120   ;;  %s271_s23 = smov [#allocation2]  }
   0x6   :  { %229 = vmatprep.subr.bf16.mxu0 %v228_v5  ;;  %v236_v12 = vpack.c.bf16 %v33_v11, %v32_v10  ;;  %v25_v13 = vld [vmem:[%s374_s0 + $0x8] sm:$0xff]  ;;  %v190_v14 = vld [vmem:[%s376_s2] ss:$0 sm:$0xff]  ;;  %s179_s24 = sshll.u32 %s271_s23, 4  ;;  %s180_s24 = int_to_ptr.vmem [resolvable:$true] %s179_s24 }
   0x7   :  { %v123_v17 = vld [vmem:[%s377_s3] sm:$0xff]  ;;  %v124_v20 = vld [vmem:[%s377_s3 + $0x8] sm:$0xff]  ;;  %p252_p1 = scmp.lt.s32.totalorder %s180_s24, %s180_s24 }
   0x8   :  { %v193_v41 = vld [vmem:[%s378_s4] ss:$0 sm:$0xff]  ;;  %s247_s4 = scalar_lea.vmem %s180_s24, 256 }
   0x9   :  { %231 = vmatpush3.bf16.msra.mxu0 %v228_v5  ;;  %v194_v44 = vld [vmem:[%s379_s5] ss:$0 sm:$0xff]  ;;  %p248_p0 = scmp.ne.s32.totalorder %s180_s24, %s247_s4  ;;  %p253_p2 = scmp.lt.s32.totalorder %s247_s4, %s247_s4 }
   0xa   :  { %233 = vmatprep.subr.bf16.mxu0 %v232_v9 }
   0xb   :  { %p254_p3 = por %p253_p2, %p252_p1 }
   0xd   :  { %235 = vmatpush3.bf16.msra.mxu0 %v232_v9  ;;  %p255_p4 = pnand %p254_p3, %p248_p0 }
   0xe   :  { %237 = vmatprep.subr.bf16.mxu0 %v236_v12 }
  0x11   :  { %239 = vmatpush3.bf16.msra.mxu0 %v236_v12 }
  0x14   :  { %222 = vmatmul.mubr.msk.f32.vlgmr.msra.gmra.mrb[0].mxu0 %vm41_vm0, %v25_v13 }
  0xe7   :  { %v223_v15 = vpop.f32.mrb[0].mxu0 }
  0xe8   :  { %v114_v16 = vpop.f32.mrb[1].mxu0  ;;  %v120_v18 = vadd.f32 %v223_v15, %v190_v14 }
  0xe9   :  { %v115_v19 = vadd.f32 %v190_v14, %v114_v16 }
  0xea   :  { %v126_v23 = vadd.f32 %v124_v20, %v120_v18 }
  0xeb   :  { %v125_v21 = vadd.f32 %v123_v17, %v115_v19 }
  0xec   :  { %v131_v24 = vsel %vm127_vm1, %v126_v23, 0.0 }
  0xed   :  { %v128_v22 = vsel %vm127_vm1, %v125_v21, 0.0 }
  0xee   :  { %129 = vadd.xlane.f32.xlu0 %v128_v22 }
  0xf2   :  { %132 = vadd.xlane.f32.xlu0 %v131_v24 }
 0x17b   :  { %v130_v25 = vpop.xlane.xlu0 %129 }
 0x17c   :  { %v134_v26 = vmul.f32 0.03125, %v130_v25 }
 0x17e   :  { %v136_v27 = vsub.f32 %v125_v21, %v134_v26 }
 0x17f   :  { %v133_v28 = vpop.xlane.xlu0 %132 }
 0x180   :  { %v135_v29 = vmul.f32 0.03125, %v133_v28  ;;  %v138_v30 = vmul.f32 %v136_v27, %v136_v27 }
 0x182   :  { %v137_v31 = vsub.f32 %v126_v23, %v135_v29  ;;  %v140_v32 = vsel %vm127_vm1, %v138_v30, 0.0 }
 0x183   :  { %141 = vadd.xlane.f32.xlu1 %v140_v32 }
 0x184   :  { %v139_v33 = vmul.f32 %v137_v31, %v137_v31 }
 0x186   :  { %v143_v34 = vsel %vm127_vm1, %v139_v33, 0.0 }
 0x187   :  { %144 = vadd.xlane.f32.xlu1 %v143_v34 }
 0x210   :  { %v142_v35 = vpop.xlane.xlu1 %141 }
 0x211   :  { %v146_v36 = vmul.f32 0.03125, %v142_v35 }
 0x213   :  { %v149_v37 = vadd.f32 1e-05, %v146_v36 }
 0x214   :  { %v145_v38 = vpop.xlane.xlu1 %144 }
 0x215   :  { %243 = vrsqrt.f32 %v149_v37  ;;  %v147_v39 = vmul.f32 0.03125, %v145_v38 }
 0x217   :  { %v150_v40 = vadd.f32 1e-05, %v147_v39 }
 0x219   :  { %245 = vrsqrt.f32 %v150_v40 }
 0x21f   :  { %v244_v42 = vpop.eup %243 }
 0x220   :  { %v159_v43 = vmul.f32 %v244_v42, %v193_v41 }
 0x222   :  { %v161_v45 = vmul.f32 %v159_v43, %v136_v27 }
 0x223   :  { %v246_v46 = vpop.eup %245 }
 0x224   :  { %v160_v47 = vmul.f32 %v246_v46, %v193_v41  ;;  %v170_v48 = vadd.f32 %v194_v44, %v161_v45 }
 0x226   :  { %v162_v49 = vmul.f32 %v160_v47, %v137_v31  ;;  %172 = vst.msk [vmem:[#allocation2] sm:$0xff] %vm127_vm1, %v170_v48 }
 0x228   :  { %v171_v50 = vadd.f32 %v194_v44, %v162_v49 }
 0x22a   :  { %173 = vst.msk [vmem:[#allocation2 + $0x8] sm:$0xff] %vm127_vm1, %v171_v50 }
 0x22b   :  { %258 = shalt.err (!%p255_p4)
}
 0x22c   :  { %s259_s26 = scalar_lea.hbm %s380_s6, 256 }
 0x22d   :  { %p260_p5 = scmp.ne.s32.totalorder %s380_s6, %s259_s26  ;;  %p263_p6 = scmp.lt.u32.totalorder %s259_s26, %s380_s6 }
 0x22f   :  { %p265_p7 = pnand %p263_p6, %p260_p5 }
 0x231   :  { %268 = shalt.err (!%p265_p7)
}
 0x232   :  { %s272_s7 = smov 128   ;;  %s273_s8 = smov 8  }
 0x233   :  { %185 = dma.vmem_to_hbm [thread:$0]  %s180_s24, 256, %s380_s6, [#allocation3], %s272_s7, %s272_s7, %s273_s8  }
 0x234   :  { %269 = dma.done.wait [#allocation3], 256  }
 0x235   :  { %270 = vsyncadd [#allocation3], 4294967040 }
 0x236   :  { %189 = vsyncpa [#allocation3], 1 }

// kernel: tpu_custom_call.1
= control target key start
LH: loop header
LB: loop body
LE: loop exit
PB: predicated region body
PF: predicated region fallthrough
CT: control target
= control target key end

     0   :  { %vm41_vm0 = vcmask 523264   ;;  %s374_s0 = inlined_call_operand.vmem [shape: f32[16,64], index: 0, kind: input, shape index: {}]   ;;  %s375_s1 = inlined_call_operand.vmem [shape: f32[64,32], index: 1, kind: input, shape index: {}]   ;;  %s376_s2 = inlined_call_operand.vmem [shape: f32[1,32], index: 2, kind: input, shape index: {}]   ;;  %s377_s3 = inlined_call_operand.vmem [shape: f32[16,32], index: 3, kind: input, shape index: {}]   ;;  %s378_s4 = inlined_call_operand.vmem [shape: f32[1,32], index: 4, kind: input, shape index: {}]   ;;  %s379_s5 = inlined_call_operand.vmem [shape: f32[1,32], index: 5, kind: input, shape index: {}]   ;;  %s380_s6 = inlined_call_operand.hbm [shape: f32[16,32], index: 6, kind: output, shape index: {}]  }
   0x1   :  { %v26_v0 = vld [vmem:[%s375_s1] sm:$0xff]  ;;  %v27_v1 = vld [vmem:[%s375_s1 + $0x8] sm:$0xff]  ;;  %v28_v2 = vld [vmem:[%s375_s1 + $0x10] sm:$0xff] }
   0x2   :  { %v224_v3 = vpack.c.bf16 %v27_v1, %v26_v0  ;;  %v29_v4 = vld [vmem:[%s375_s1 + $0x18] sm:$0xff]  ;;  %v30_v6 = vld [vmem:[%s375_s1 + $0x20] sm:$0xff]  ;;  %v31_v7 = vld [vmem:[%s375_s1 + $0x28] sm:$0xff] }
   0x3   :  { %v228_v5 = vpack.c.bf16 %v29_v4, %v28_v2  ;;  %v24_v8 = vld [vmem:[%s374_s0] sm:$0xff] }
   0x4   :  { %225 = vmatprep.subr.bf16.mxu0 %v224_v3  ;;  %221 = vmatprep.mubr.msk.f32.mxu0 %vm41_vm0, %v24_v8 }
   0x5   :  { %11 = vsyncpa [#allocation3], 0  ;;  %227 = vmatpush3.bf16.msra.mxu0 %v224_v3  ;;  %v232_v9 = vpack.c.bf16 %v31_v7, %v30_v6  ;;  %v32_v10 = vld [vmem:[%s375_s1 + $0x30] sm:$0xff]  ;;  %v33_v11 = vld [vmem:[%s375_s1 + $0x38] sm:$0xff]  ;;  %vm127_vm1 = vcmask 261120   ;;  %s271_s23 = smov [#allocation2]  }
   0x6   :  { %229 = vmatprep.subr.bf16.mxu0 %v228_v5  ;;  %v236_v12 = vpack.c.bf16 %v33_v11, %v32_v10  ;;  %v25_v13 = vld [vmem:[%s374_s0 + $0x8] sm:$0xff]  ;;  %v190_v14 = vld [vmem:[%s376_s2] ss:$0 sm:$0xff]  ;;  %s179_s24 = sshll.u32 %s271_s23, 4  ;;  %s180_s24 = int_to_ptr.vmem [resolvable:$true] %s179_s24 }
   0x7   :  { %v123_v17 = vld [vmem:[%s377_s3] sm:$0xff]  ;;  %v124_v20 = vld [vmem:[%s377_s3 + $0x8] sm:$0xff]  ;;  %p252_p1 = scmp.lt.s32.totalorder %s180_s24, %s180_s24 }
   0x8   :  { %v193_v41 = vld [vmem:[%s378_s4] ss:$0 sm:$0xff]  ;;  %s247_s4 = scalar_lea.vmem %s180_s24, 256 }
   0x9   :  { %231 = vmatpush3.bf16.msra.mxu0 %v228_v5  ;;  %v194_v44 = vld [vmem:[%s379_s5] ss:$0 sm:$0xff]  ;;  %p248_p0 = scmp.ne.s32.totalorder %s180_s24, %s247_s4  ;;  %p253_p2 = scmp.lt.s32.totalorder %s247_s4, %s247_s4 }
   0xa   :  { %233 = vmatprep.subr.bf16.mxu0 %v232_v9 }
   0xb   :  { %p254_p3 = por %p253_p2, %p252_p1 }
   0xd   :  { %235 = vmatpush3.bf16.msra.mxu0 %v232_v9  ;;  %p255_p4 = pnand %p254_p3, %p248_p0 }
   0xe   :  { %237 = vmatprep.subr.bf16.mxu0 %v236_v12 }
  0x11   :  { %239 = vmatpush3.bf16.msra.mxu0 %v236_v12 }
  0x14   :  { %222 = vmatmul.mubr.msk.f32.vlgmr.msra.gmra.mrb[0].mxu0 %vm41_vm0, %v25_v13 }
  0xe7   :  { %v223_v15 = vpop.f32.mrb[0].mxu0 }
  0xe8   :  { %v114_v16 = vpop.f32.mrb[1].mxu0  ;;  %v120_v18 = vadd.f32 %v223_v15, %v190_v14 }
  0xe9   :  { %v115_v19 = vadd.f32 %v190_v14, %v114_v16 }
  0xea   :  { %v126_v23 = vadd.f32 %v124_v20, %v120_v18 }
  0xeb   :  { %v125_v21 = vadd.f32 %v123_v17, %v115_v19 }
  0xec   :  { %v131_v24 = vsel %vm127_vm1, %v126_v23, 0.0 }
  0xed   :  { %v128_v22 = vsel %vm127_vm1, %v125_v21, 0.0 }
  0xee   :  { %129 = vadd.xlane.f32.xlu0 %v128_v22 }
  0xf2   :  { %132 = vadd.xlane.f32.xlu0 %v131_v24 }
 0x17b   :  { %v130_v25 = vpop.xlane.xlu0 %129 }
 0x17c   :  { %v134_v26 = vmul.f32 0.03125, %v130_v25 }
 0x17e   :  { %v136_v27 = vsub.f32 %v125_v21, %v134_v26 }
 0x17f   :  { %v133_v28 = vpop.xlane.xlu0 %132 }
 0x180   :  { %v135_v29 = vmul.f32 0.03125, %v133_v28  ;;  %v138_v30 = vmul.f32 %v136_v27, %v136_v27 }
 0x182   :  { %v137_v31 = vsub.f32 %v126_v23, %v135_v29  ;;  %v140_v32 = vsel %vm127_vm1, %v138_v30, 0.0 }
 0x183   :  { %141 = vadd.xlane.f32.xlu1 %v140_v32 }
 0x184   :  { %v139_v33 = vmul.f32 %v137_v31, %v137_v31 }
 0x186   :  { %v143_v34 = vsel %vm127_vm1, %v139_v33, 0.0 }
 0x187   :  { %144 = vadd.xlane.f32.xlu1 %v143_v34 }
 0x210   :  { %v142_v35 = vpop.xlane.xlu1 %141 }
 0x211   :  { %v146_v36 = vmul.f32 0.03125, %v142_v35 }
 0x213   :  { %v149_v37 = vadd.f32 1e-05, %v146_v36 }
 0x214   :  { %v145_v38 = vpop.xlane.xlu1 %144 }
 0x215   :  { %243 = vrsqrt.f32 %v149_v37  ;;  %v147_v39 = vmul.f32 0.03125, %v145_v38 }
 0x217   :  { %v150_v40 = vadd.f32 1e-05, %v147_v39 }
 0x219   :  { %245 = vrsqrt.f32 %v150_v40 }
 0x21f   :  { %v244_v42 = vpop.eup %243 }
 0x220   :  { %v159_v43 = vmul.f32 %v244_v42, %v193_v41 }
 0x222   :  { %v161_v45 = vmul.f32 %v159_v43, %v136_v27 }
 0x223   :  { %v246_v46 = vpop.eup %245 }
 0x224   :  { %v160_v47 = vmul.f32 %v246_v46, %v193_v41  ;;  %v170_v48 = vadd.f32 %v194_v44, %v161_v45 }
 0x226   :  { %v162_v49 = vmul.f32 %v160_v47, %v137_v31  ;;  %172 = vst.msk [vmem:[#allocation2] sm:$0xff] %vm127_vm1, %v170_v48 }
 0x228   :  { %v171_v50 = vadd.f32 %v194_v44, %v162_v49 }
 0x22a   :  { %173 = vst.msk [vmem:[#allocation2 + $0x8] sm:$0xff] %vm127_vm1, %v171_v50 }
 0x22b   :  { %258 = shalt.err (!%p255_p4)
}
 0x22c   :  { %s259_s26 = scalar_lea.hbm %s380_s6, 256 }
 0x22d   :  { %p260_p5 = scmp.ne.s32.totalorder %s380_s6, %s259_s26  ;;  %p263_p6 = scmp.lt.u32.totalorder %s259_s26, %s380_s6 }
 0x22f   :  { %p265_p7 = pnand %p263_p6, %p260_p5 }
 0x231   :  { %268 = shalt.err (!%p265_p7)
}
 0x232   :  { %s272_s7 = smov 128   ;;  %s273_s8 = smov 8  }
 0x233   :  { %185 = dma.vmem_to_hbm [thread:$0]  %s180_s24, 256, %s380_s6, [#allocation3], %s272_s7, %s272_s7, %s273_s8  }
 0x234   :  { %269 = dma.done.wait [#allocation3], 256  }
 0x235   :  { %270 = vsyncadd [#allocation3], 4294967040 }
 0x236   :  { %189 = vsyncpa [#allocation3], 1 }

</bundles_post_ra>
